<compile_context>
chip_gen: v7x
topology: tpu7x:2x2x1
jax: 0.10.0
libtpu: 0.0.40
codegen_flags: <defaults>
</compile_context>

<pallas_src>
import functools

import jax
import jax.numpy as jnp
from jax.experimental import pallas as pl
from jax.experimental.pallas import tpu as pltpu


def _round_up(x: int, m: int) -> int:
    return (x + m - 1) // m * m


def _pad2d(a, rows: int, cols: int):
    pr, pc = rows - a.shape[0], cols - a.shape[1]
    if pr == 0 and pc == 0:
        return a
    return jnp.pad(a, ((0, pr), (0, pc)))


def _best_tile(padded: int, requested: int, quantum: int) -> int:
    """Largest multiple of `quantum` that divides `padded` and is <= requested."""
    n = padded // quantum
    cap = max(1, min(n, requested // quantum))
    best = 1
    for d in range(1, n + 1):
        if n % d == 0 and d <= cap:
            best = d
    return best * quantum


# ---------------------------------------------------------------------------
# Kernels
# ---------------------------------------------------------------------------

def _indrnn_kernel_fullk(x_ref, w_ref, h_ref, u_ref, b_ref, out_ref):
    """Full reduction dim resident in VMEM: one MXU matmul + fused epilogue."""
    acc = jnp.dot(x_ref[...], w_ref[...], preferred_element_type=jnp.float32)
    h_t = acc + u_ref[...] * h_ref[...].astype(jnp.float32) + b_ref[...]
    out_ref[...] = jnp.maximum(h_t, 0.0).astype(out_ref.dtype)


def _indrnn_kernel_ksplit(x_ref, w_ref, h_ref, u_ref, b_ref, out_ref, acc_ref):
    """Fallback: reduction over I split across grid axis 2 with f32 accumulator."""
    k = pl.program_id(2)

    @pl.when(k == 0)
    def _():
        acc_ref[...] = jnp.zeros_like(acc_ref)

    acc_ref[...] += jnp.dot(
        x_ref[...], w_ref[...], preferred_element_type=jnp.float32
    )

    @pl.when(k == pl.num_programs(2) - 1)
    def _():
        h_t = acc_ref[...] + u_ref[...] * h_ref[...].astype(jnp.float32) + b_ref[...]
        out_ref[...] = jnp.maximum(h_t, 0.0).astype(out_ref.dtype)


# ---------------------------------------------------------------------------
# Parameter prep (once per model, NOT per step)
# ---------------------------------------------------------------------------

def prepare_indrnn_params(weight, lin_bias, rec_weights, bias,
                          *, matmul_dtype=jnp.bfloat16):
    """Transpose + pad W to (Ip, Hp); fuse + pad biases / recurrent weights.

    weight: (H, I) PyTorch nn.Linear layout; lin_bias/rec_weights/bias: (H,).
    bf16 matmul operands are MXU-native on v5e/v6e/v7x and halve the dominant
    W DMA stream; the accumulator and epilogue stay f32.  Note: bf16 also
    quantizes the activations x (both MXU operands).  Pass jnp.float32 for a
    full-precision path.
    Returns (w_p (Ip, Hp) matmul_dtype, u_p (1, Hp) f32, fused_bias_p (1, Hp) f32).
    """
    weight = jnp.asarray(weight)
    H, I = weight.shape
    Ip, Hp = _round_up(I, 128), _round_up(H, 128)
    w_p = _pad2d(weight.T.astype(matmul_dtype), Ip, Hp)
    u_p = _pad2d(jnp.asarray(rec_weights).astype(jnp.float32).reshape(1, H), 1, Hp)
    b_fused = (jnp.asarray(lin_bias) + jnp.asarray(bias)).astype(jnp.float32)
    b_p = _pad2d(b_fused.reshape(1, H), 1, Hp)
    return w_p, u_p, b_p


# ---------------------------------------------------------------------------
# Cell wrappers
# ---------------------------------------------------------------------------

# Conservative per-call VMEM budget for the resident-W path (double-buffered);
# safe on v7x (64 MiB total VMEM) and leaves headroom on v5e/v6e (128 MiB).
_FULLK_VMEM_BUDGET = 20 * 1024 * 1024
_VMEM_LIMIT_CAP = 48 * 1024 * 1024


@functools.partial(jax.jit, static_argnames=("tm", "tn", "tk"))
def indrnn_cell_padded(x_p, h_p, w_p, u_p, b_p,
                       *, tm: int = 256, tn: int = 512, tk: int = 1024):
    """Padded-layout step.  x_p: (Bp, Ip), h_p: (Bp, Hp), w_p: (Ip, Hp),
    u_p/b_p: (1, Hp).  Returns h_t: (Bp, Hp) in h_p.dtype.

    For sequences, keep the recurrent state in this padded layout across steps
    (and hold x in the matmul dtype) to avoid per-step pad/slice/cast copies.
    """
    Bp, Ip = x_p.shape
    Ipw, Hp = w_p.shape
    assert Ipw == Ip and h_p.shape == (Bp, Hp)
    assert u_p.shape == (1, Hp) and b_p.shape == (1, Hp)
    assert Hp % 128 == 0 and Ip % 128 == 0 and Bp % 8 == 0

    if x_p.dtype != w_p.dtype:
        x_p = x_p.astype(w_p.dtype)

    mm_bytes = jnp.dtype(w_p.dtype).itemsize
    h_bytes = jnp.dtype(h_p.dtype).itemsize
    # bf16 packs 2 rows per sublane: use a 16-row batch quantum when possible.
    row_q = 16 if (mm_bytes < 4 and Bp % 16 == 0) else 8

    tm = _best_tile(Bp, tm, row_q)
    tn = _best_tile(Hp, tn, 128)
    # v7x has 2 TensorCores sharded over "parallel" axes: make sure the grid
    # has >= 2 parallel tiles (no-op on v5e/v6e).
    if Bp // tm == 1 and Hp // tn == 1 and Hp >= 256:
        tn = _best_tile(Hp, Hp // 2, 128)

    # Estimated double-buffered VMEM for the resident-W (full-K) path.
    fullk_est = 2 * (tm * Ip * mm_bytes            # x tile
                     + Ip * tn * mm_bytes          # resident W panel
                     + tm * tn * h_bytes           # h_prev tile
                     + 2 * tn * 4                  # u, fused bias
                     + tm * tn * h_bytes)          # output tile
    use_fullk = fullk_est <= _FULLK_VMEM_BUDGET

    if use_fullk:
        vmem_limit = int(min(_VMEM_LIMIT_CAP, max(32 * 1024 * 1024, 2 * fullk_est)))
        # Grid: hidden tiles outer, batch tiles INNER -> the W block index
        # depends only on j, so the (Ip, tn) panel is DMA'd once per j and
        # stays resident across all batch tiles.
        return pl.pallas_call(
            _indrnn_kernel_fullk,
            out_shape=jax.ShapeDtypeStruct((Bp, Hp), h_p.dtype),
            grid=(Hp // tn, Bp // tm),
            in_specs=[
                pl.BlockSpec((tm, Ip), lambda j, i: (i, 0)),   # x
                pl.BlockSpec((Ip, tn), lambda j, i: (0, j)),   # W (resident across i)
                pl.BlockSpec((tm, tn), lambda j, i: (i, j)),   # h_prev
                pl.BlockSpec((1, tn), lambda j, i: (0, j)),    # recurrent weights
                pl.BlockSpec((1, tn), lambda j, i: (0, j)),    # fused bias
            ],
            out_specs=pl.BlockSpec((tm, tn), lambda j, i: (i, j)),
            compiler_params=pltpu.CompilerParams(
                dimension_semantics=("parallel", "parallel"),
                vmem_limit_bytes=vmem_limit,
            ),
        )(x_p, w_p, h_p, u_p, b_p)

    # Fallback: split the reduction over a trailing "arbitrary" grid axis.
    tk = _best_tile(Ip, tk, 128)
    ksplit_est = (2 * (tm * tk * mm_bytes + tk * tn * mm_bytes
                       + tm * tn * h_bytes + 2 * tn * 4 + tm * tn * h_bytes)
                  + tm * tn * 4)
    vmem_limit = int(min(_VMEM_LIMIT_CAP, max(32 * 1024 * 1024, 2 * ksplit_est)))
    return pl.pallas_call(
        _indrnn_kernel_ksplit,
        out_shape=jax.ShapeDtypeStruct((Bp, Hp), h_p.dtype),
        grid=(Bp // tm, Hp // tn, Ip // tk),
        in_specs=[
            pl.BlockSpec((tm, tk), lambda i, j, k: (i, k)),   # x
            pl.BlockSpec((tk, tn), lambda i, j, k: (k, j)),   # W
            pl.BlockSpec((tm, tn), lambda i, j, k: (i, j)),   # h_prev
            pl.BlockSpec((1, tn), lambda i, j, k: (0, j)),    # recurrent weights
            pl.BlockSpec((1, tn), lambda i, j, k: (0, j)),    # fused bias
        ],
        out_specs=pl.BlockSpec((tm, tn), lambda i, j, k: (i, j)),
        scratch_shapes=[pltpu.VMEM((tm, tn), jnp.float32)],
        compiler_params=pltpu.CompilerParams(
            dimension_semantics=("parallel", "parallel", "arbitrary"),
            vmem_limit_bytes=vmem_limit,
        ),
    )(x_p, w_p, h_p, u_p, b_p)


@functools.partial(jax.jit, static_argnames=("tm", "tn", "tk"))
def indrnn_cell(x_t, h_prev, w_p, u_p, b_p,
                *, tm: int = 256, tn: int = 512, tk: int = 1024):
    """Convenience single-step wrapper: x_t (B, I), h_prev (B, H), params from
    prepare_indrnn_params.  Pads to the kernel layout and slices back."""
    B, I = x_t.shape
    Bh, H = h_prev.shape
    assert Bh == B
    Ip, Hp = w_p.shape
    assert Ip >= I and Hp >= H

    mm_dtype = w_p.dtype
    row_q = 16 if jnp.dtype(mm_dtype).itemsize < 4 else 8
    Bp = _round_up(B, row_q)

    x_p = _pad2d(x_t.astype(mm_dtype), Bp, Ip)
    h_p = _pad2d(h_prev, Bp, Hp)
    out = indrnn_cell_padded(x_p, h_p, w_p, u_p, b_p, tm=tm, tn=tn, tk=tk)
    return out[:B, :H]


# ---------------------------------------------------------------------------
# Demo / correctness check
# ---------------------------------------------------------------------------

if __name__ == "__main__":
    batch = 8
    input_size = 16
    hidden_size = 32

    key = jax.random.PRNGKey(0)
    kx, kh, kw, kb = jax.random.split(key, 4)

    x_t = jax.random.normal(kx, (batch, input_size), dtype=jnp.float32)
    h_prev = jax.random.normal(kh, (batch, hidden_size), dtype=jnp.float32)

    # Parameter init mirroring the module: nn.Linear uniform init,
    # recurrent_weights = ones, bias = zeros.
    bound = 1.0 / (input_size ** 0.5)
    weight = jax.random.uniform(kw, (hidden_size, input_size),
                                minval=-bound, maxval=bound, dtype=jnp.float32)
    lin_bias = jax.random.uniform(kb, (hidden_size,),
                                  minval=-bound, maxval=bound, dtype=jnp.float32)
    rec_weights = jnp.ones((hidden_size,), dtype=jnp.float32)
    bias = jnp.zeros((hidden_size,), dtype=jnp.float32)

    # Plain-JAX reference.
    ref = jnp.maximum(x_t @ weight.T + lin_bias + rec_weights * h_prev + bias, 0.0)

    # f32 matmul path (tight tolerance).
    w_f32, u_f32, b_f32 = prepare_indrnn_params(
        weight, lin_bias, rec_weights, bias, matmul_dtype=jnp.float32)
    h_f32 = jax.block_until_ready(indrnn_cell(x_t, h_prev, w_f32, u_f32, b_f32))
    assert h_f32.shape == (batch, hidden_size)
    assert jnp.allclose(h_f32, ref, atol=1e-5, rtol=1e-5)

    # bf16 matmul operands (default; MXU-native on v5e/v6e/v7x), f32 epilogue.
    w_bf, u_bf, b_bf = prepare_indrnn_params(weight, lin_bias, rec_weights, bias)
    h_bf = jax.block_until_ready(indrnn_cell(x_t, h_prev, w_bf, u_bf, b_bf))
    assert h_bf.shape == (batch, hidden_size)
    assert jnp.allclose(h_bf, ref, atol=5e-2, rtol=5e-2)

    # Padded-layout path (what a sequence driver would carry across steps).
    Bp = _round_up(batch, 16)
    Ip, Hp = w_bf.shape
    x_p = _pad2d(x_t.astype(w_bf.dtype), Bp, Ip)
    h_p = _pad2d(h_prev, Bp, Hp)
    h_pad = jax.block_until_ready(indrnn_cell_padded(x_p, h_p, w_bf, u_bf, b_bf))
    assert h_pad.shape == (Bp, Hp)
    assert jnp.allclose(h_pad[:batch, :hidden_size], ref, atol=5e-2, rtol=5e-2)

    print("KERNEL_OK")
</pallas_src>

<mosaic_0001>
module attributes {stable_mosaic.version = 11 : i64} {
  func.func @_indrnn_kernel_fullk(%arg0: i32, %arg1: i32, %arg2: memref<8x128xf32, #tpu.memory_space<vmem>>, %arg3: memref<128x128xf32, #tpu.memory_space<vmem>>, %arg4: memref<8x128xf32, #tpu.memory_space<vmem>>, %arg5: memref<1x128xf32, #tpu.memory_space<vmem>>, %arg6: memref<1x128xf32, #tpu.memory_space<vmem>>, %arg7: memref<8x128xf32, #tpu.memory_space<vmem>>) attributes {dimension_semantics = [#tpu.dimension_semantics<parallel>, #tpu.dimension_semantics<parallel>], iteration_bounds = array<i64: 1, 1>, scalar_prefetch = 0 : i64, scratch_operands = 0 : i64, tpu.core_type = #tpu.core_type<tc>, window_params = [{transform_indices = @transform_0, window_bounds = array<i64: 8, 128>}, {transform_indices = @transform_1, window_bounds = array<i64: 128, 128>}, {transform_indices = @transform_2, window_bounds = array<i64: 8, 128>}, {transform_indices = @transform_3, window_bounds = array<i64: 1, 128>}, {transform_indices = @transform_4, window_bounds = array<i64: 1, 128>}, {transform_indices = @transform_5, window_bounds = array<i64: 8, 128>}]} {
    %c0 = arith.constant 0 : index
    %c0_0 = arith.constant 0 : index
    %0 = vector.load %arg2[%c0, %c0_0] : memref<8x128xf32, #tpu.memory_space<vmem>>, vector<8x128xf32>
    %c0_1 = arith.constant 0 : index
    %c0_2 = arith.constant 0 : index
    %1 = vector.load %arg3[%c0_1, %c0_2] : memref<128x128xf32, #tpu.memory_space<vmem>>, vector<128x128xf32>
    %cst = arith.constant dense<0.000000e+00> : vector<8x128xf32>
    %2 = tpu.matmul %0, %1, %cst {dimension_numbers = #tpu.dot_dimension_numbers<[1], [0], [0], [1], [0, 0, 1, 1], [], []>} : vector<8x128xf32>, vector<128x128xf32>, vector<8x128xf32> -> vector<8x128xf32>
    %c0_3 = arith.constant 0 : index
    %c0_4 = arith.constant 0 : index
    %3 = vector.load %arg5[%c0_3, %c0_4] : memref<1x128xf32, #tpu.memory_space<vmem>>, vector<1x128xf32>
    %c0_5 = arith.constant 0 : index
    %c0_6 = arith.constant 0 : index
    %4 = vector.load %arg4[%c0_5, %c0_6] : memref<8x128xf32, #tpu.memory_space<vmem>>, vector<8x128xf32>
    %5 = vector.broadcast %3 : vector<1x128xf32> to vector<8x128xf32>
    %6 = arith.mulf %5, %4 : vector<8x128xf32>
    %7 = arith.addf %2, %6 : vector<8x128xf32>
    %c0_7 = arith.constant 0 : index
    %c0_8 = arith.constant 0 : index
    %8 = vector.load %arg6[%c0_7, %c0_8] : memref<1x128xf32, #tpu.memory_space<vmem>>, vector<1x128xf32>
    %9 = vector.broadcast %8 : vector<1x128xf32> to vector<8x128xf32>
    %10 = arith.addf %7, %9 : vector<8x128xf32>
    %cst_9 = arith.constant 0.000000e+00 : f32
    %11 = vector.broadcast %cst_9 : f32 to vector<8x128xf32>
    %12 = arith.maximumf %10, %11 : vector<8x128xf32>
    %c0_10 = arith.constant 0 : index
    %c0_11 = arith.constant 0 : index
    %13 = vector.load %arg7[%c0_10, %c0_11] : memref<8x128xf32, #tpu.memory_space<vmem>>, vector<8x128xf32>
    tpu.vector_store %arg7[%c0_10, %c0_11], %12 {strides = array<i32>} : memref<8x128xf32, #tpu.memory_space<vmem>>, vector<8x128xf32>,
    return
  }
  func.func @transform_0(%arg0: i32, %arg1: i32) -> (i32, i32) {
    %c0_i32 = arith.constant 0 : i32
    %c0_i32_0 = arith.constant 0 : i32
    return %arg1, %c0_i32 : i32, i32
  }
  func.func @transform_1(%arg0: i32, %arg1: i32) -> (i32, i32) {
    %c0_i32 = arith.constant 0 : i32
    %c0_i32_0 = arith.constant 0 : i32
    return %c0_i32, %arg0 : i32, i32
  }
  func.func @transform_2(%arg0: i32, %arg1: i32) -> (i32, i32) {
    %c0_i32 = arith.constant 0 : i32
    return %arg1, %arg0 : i32, i32
  }
  func.func @transform_3(%arg0: i32, %arg1: i32) -> (i32, i32) {
    %c0_i32 = arith.constant 0 : i32
    %c0_i32_0 = arith.constant 0 : i32
    return %c0_i32, %arg0 : i32, i32
  }
  func.func @transform_4(%arg0: i32, %arg1: i32) -> (i32, i32) {
    %c0_i32 = arith.constant 0 : i32
    %c0_i32_0 = arith.constant 0 : i32
    return %c0_i32, %arg0 : i32, i32
  }
  func.func @transform_5(%arg0: i32, %arg1: i32) -> (i32, i32) {
    %c0_i32 = arith.constant 0 : i32
    return %arg1, %arg0 : i32, i32
  }
}

</mosaic_0001>

<bundles_post_ra>
// kernel: indrnn_cell_padded.1
= control target key start
LH: loop header
LB: loop body
LE: loop exit
PB: predicated region body
PF: predicated region fallthrough
CT: control target
= control target key end

     0   :  { %10 = vsyncpa [#allocation3], 0  ;;  %s454_s0 = inlined_call_operand.hbm [shape: f32[8,128], index: 0, kind: input, shape index: {}]   ;;  %s455_s1 = inlined_call_operand.hbm [shape: f32[128,128], index: 1, kind: input, shape index: {}]   ;;  %s456_s2 = inlined_call_operand.hbm [shape: f32[8,128], index: 2, kind: input, shape index: {}]   ;;  %s457_s3 = inlined_call_operand.vmem [shape: f32[1,128], index: 3, kind: input, shape index: {}]   ;;  %s458_s4 = inlined_call_operand.vmem [shape: f32[1,128], index: 4, kind: input, shape index: {}]   ;;  %s459_s5 = inlined_call_operand.hbm [shape: f32[8,128], index: 5, kind: output, shape index: {}]  }
   0x1   :  { %11 = vsyncpa [#allocation6], 0 }
   0x2   :  { %12 = vsyncpa [#allocation4], 0  ;;  %s361_s18 = smov [#allocation5]   ;;  %s267_s22 = scalar_lea.hbm %s455_s1, 2048 }
   0x3   :  { %s28_s19 = sshll.u32 %s361_s18, 4  ;;  %p268_p0 = scmp.ne.s32.totalorder %s455_s1, %s267_s22  ;;  %s29_s19 = int_to_ptr.vmem [resolvable:$true] %s28_s19 }
   0x4   :  { %p271_p1 = scmp.lt.u32.totalorder %s267_s22, %s455_s1 }
   0x6   :  { %p273_p2 = pnand %p271_p1, %p268_p0 }
   0x8   :  { %276 = shalt.err (!%p273_p2)
}
   0x9   :  { %s277_s27 = scalar_lea.vmem %s29_s19, 2048  ;;  %p282_p4 = scmp.lt.s32.totalorder %s29_s19, %s29_s19 }
   0xa   :  { %p278_p3 = scmp.ne.s32.totalorder %s29_s19, %s277_s27  ;;  %p283_p5 = scmp.lt.s32.totalorder %s277_s27, %s277_s27 }
   0xc   :  { %p284_p6 = por %p283_p5, %p282_p4 }
   0xe   :  { %p285_p7 = pnand %p284_p6, %p278_p3 }
  0x10   :  { %288 = shalt.err (!%p285_p7)
}
  0x11   :  { %s362_s28 = smov 128   ;;  %s363_s29 = smov 8  }
  0x12   :  { %34 = dma.hbm_to_vmem [thread:$0]  %s455_s1, 2048, %s29_s19, [#allocation6], %s362_s28, %s362_s28, %s363_s29  }
  0x13   :  { %s364_s7 = smov [#allocation2]   ;;  %s365_s9 = smov [#allocation7]  }
  0x14   :  { %s19_s8 = sshll.u32 %s364_s7, 4  ;;  %s41_s10 = sshll.u32 %s365_s9, 4  ;;  %s20_s8 = int_to_ptr.vmem [resolvable:$true] %s19_s8  ;;  %s42_s10 = int_to_ptr.vmem [resolvable:$true] %s41_s10 }
  0x15   :  { %s289_s13 = scalar_lea.hbm %s454_s0, 128 }
  0x16   :  { %p290_p8 = scmp.ne.s32.totalorder %s454_s0, %s289_s13  ;;  %p293_p9 = scmp.lt.u32.totalorder %s289_s13, %s454_s0 }
  0x18   :  { %p295_p10 = pnand %p293_p9, %p290_p8 }
  0x1a   :  { %298 = shalt.err (!%p295_p10)
}
  0x1b   :  { %s299_s1 = scalar_lea.vmem %s20_s8, 128  ;;  %p304_p12 = scmp.lt.s32.totalorder %s20_s8, %s20_s8 }
  0x1c   :  { %p300_p11 = scmp.ne.s32.totalorder %s20_s8, %s299_s1  ;;  %p305_p13 = scmp.lt.s32.totalorder %s299_s1, %s299_s1 }
  0x1e   :  { %p306_p0 = por %p305_p13, %p304_p12 }
  0x20   :  { %p307_p1 = pnand %p306_p0, %p300_p11 }
  0x22   :  { %310 = shalt.err (!%p307_p1)
}
  0x23   :  { %22 = dma.hbm_to_vmem [thread:$0]  %s454_s0, 128, %s20_s8, [#allocation3]  }
  0x24   :  { %s311_s22 = scalar_lea.hbm %s456_s2, 128 }
  0x25   :  { %p312_p2 = scmp.ne.s32.totalorder %s456_s2, %s311_s22  ;;  %p315_p3 = scmp.lt.u32.totalorder %s311_s22, %s456_s2 }
  0x27   :  { %p317_p4 = pnand %p315_p3, %p312_p2 }
  0x29   :  { %320 = shalt.err (!%p317_p4)
}
  0x2a   :  { %s321_s27 = scalar_lea.vmem %s42_s10, 128  ;;  %p326_p6 = scmp.lt.s32.totalorder %s42_s10, %s42_s10 }
  0x2b   :  { %p322_p5 = scmp.ne.s32.totalorder %s42_s10, %s321_s27  ;;  %p327_p7 = scmp.lt.s32.totalorder %s321_s27, %s321_s27 }
  0x2d   :  { %p328_p8 = por %p327_p7, %p326_p6 }
  0x2f   :  { %p329_p9 = pnand %p328_p8, %p322_p5 }
  0x31   :  { %332 = shalt.err (!%p329_p9)
}
  0x32   :  { %44 = dma.hbm_to_vmem [thread:$0]  %s456_s2, 128, %s42_s10, [#allocation6]  }
  0x33   :  { %355 = dma.done.wait [#allocation3], 128  }
  0x34   :  { %356 = vsyncadd [#allocation3], 4294967168 }
  0x35   :  { %357 = dma.done.wait [#allocation6], 2176  }
  0x36   :  { %358 = vsyncadd [#allocation6], 4294965120  ;;  %v366_v0 = vmov 0.0|0.0   ;;  %vm367_vm0 = vmmov 0   ;;  %v368_v1 = vmov 0.0   ;;  %v59_v2 = vld [vmem:[#allocation5] sm:$0xff] }
  0x37   :  { %234 = vmatprep.subr.bf16.mxu0 %v366_v0  ;;  %231 = vmatprep.mubr.msk.f32.mxu0 %vm367_vm0, %v368_v1  ;;  %v60_v3 = vld [vmem:[#allocation5 + $0x8] sm:$0xff]  ;;  %v61_v4 = vld [vmem:[#allocation5 + $0x10] sm:$0xff]  ;;  %v62_v6 = vld [vmem:[#allocation5 + $0x18] sm:$0xff]  ;;  %s369_s7 = smov [#allocation8]  }
  0x38   :  { %v235_v5 = vpack.c.bf16 %v60_v3, %v59_v2  ;;  %v238_v7 = vpack.c.bf16 %v62_v6, %v61_v4  ;;  %v63_v8 = vld [vmem:[#allocation5 + $0x20] sm:$0xff]  ;;  %v64_v9 = vld [vmem:[#allocation5 + $0x28] sm:$0xff]  ;;  %v65_v11 = vld [vmem:[#allocation5 + $0x30] sm:$0xff]  ;;  %s170_s8 = sshll.u32 %s369_s7, 4  ;;  %s171_s8 = int_to_ptr.vmem [resolvable:$true] %s170_s8 }
  0x39   :  { %v241_v10 = vpack.c.bf16 %v64_v9, %v63_v8  ;;  %v66_v12 = vld [vmem:[#allocation5 + $0x38] sm:$0xff]  ;;  %v67_v14 = vld [vmem:[#allocation5 + $0x40] sm:$0xff]  ;;  %v68_v15 = vld [vmem:[#allocation5 + $0x48] sm:$0xff]  ;;  %s333_s9 = scalar_lea.vmem %s171_s8, 128  ;;  %p338_p11 = scmp.lt.s32.totalorder %s171_s8, %s171_s8 }
  0x3a   :  { %236 = vmatpush3.bf16.msra.mxu0 %v235_v5  ;;  %v244_v13 = vpack.c.bf16 %v66_v12, %v65_v11  ;;  %v247_v16 = vpack.c.bf16 %v68_v15, %v67_v14  ;;  %v69_v17 = vld [vmem:[#allocation5 + $0x50] sm:$0xff]  ;;  %v70_v18 = vld [vmem:[#allocation5 + $0x58] sm:$0xff]  ;;  %v71_v20 = vld [vmem:[#allocation5 + $0x60] sm:$0xff]  ;;  %p334_p10 = scmp.ne.s32.totalorder %s171_s8, %s333_s9  ;;  %p339_p12 = scmp.lt.s32.totalorder %s333_s9, %s333_s9 }
  0x3b   :  { %237 = vmatprep.subr.bf16.mxu0 %v366_v0  ;;  %v250_v19 = vpack.c.bf16 %v70_v18, %v69_v17  ;;  %v72_v21 = vld [vmem:[#allocation5 + $0x68] sm:$0xff]  ;;  %v73_v23 = vld [vmem:[#allocation5 + $0x70] sm:$0xff]  ;;  %v74_v24 = vld [vmem:[#allocation5 + $0x78] sm:$0xff] }
  0x3c   :  { %v253_v22 = vpack.c.bf16 %v72_v21, %v71_v20  ;;  %v256_v25 = vpack.c.bf16 %v74_v24, %v73_v23  ;;  %v58_v26 = vld [vmem:[#allocation2] sm:$0xff]  ;;  %v76_v28 = vld [vmem:[#allocation7] sm:$0xff]  ;;  %p340_p13 = por %p339_p12, %p338_p11 }
  0x3d   :  { %v180_v27 = vld [vmem:[%s457_s3] ss:$0 sm:$0xff] }
  0x3e   :  { %239 = vmatpush3.bf16.msra.mxu0 %v238_v7  ;;  %v83_v29 = vmul.f32 %v180_v27, %v76_v28  ;;  %v181_v31 = vld [vmem:[%s458_s4] ss:$0 sm:$0xff]  ;;  %p341_p0 = pnand %p340_p13, %p334_p10 }
  0x3f   :  { %240 = vmatprep.subr.bf16.mxu0 %v366_v0 }
  0x42   :  { %242 = vmatpush3.bf16.msra.mxu0 %v241_v10 }
  0x43   :  { %243 = vmatprep.subr.bf16.mxu0 %v366_v0 }
  0x46   :  { %245 = vmatpush3.bf16.msra.mxu0 %v244_v13 }
  0x47   :  { %246 = vmatprep.subr.bf16.mxu0 %v366_v0 }
  0x4a   :  { %248 = vmatpush3.bf16.msra.mxu0 %v247_v16 }
  0x4b   :  { %249 = vmatprep.subr.bf16.mxu0 %v366_v0 }
  0x4e   :  { %251 = vmatpush3.bf16.msra.mxu0 %v250_v19 }
  0x4f   :  { %252 = vmatprep.subr.bf16.mxu0 %v366_v0 }
  0x52   :  { %254 = vmatpush3.bf16.msra.mxu0 %v253_v22 }
  0x53   :  { %255 = vmatprep.subr.bf16.mxu0 %v366_v0 }
  0x56   :  { %257 = vmatpush3.bf16.msra.mxu0 %v256_v25 }
  0x59   :  { %232 = vmatmul.mubr.f32.vlgmr.msra.gmra.mrb[0].mxu0 %v58_v26 }
 0x12c   :  { %v150_v30 = vpop.f32.mrb[0].mxu0 }
 0x12d   :  { %v151_v32 = vadd.f32 %v150_v30, %v83_v29  ;;  %v233_v33 = vpop.f32.mrb[1].mxu0 }
 0x12f   :  { %v161_v34 = vadd.f32 %v181_v31, %v151_v32 }
 0x131   :  { %v162_v35 = vmax.f32 %v161_v34, 0.0 }
 0x133   :  { %163 = vst [vmem:[#allocation8] sm:$0xff] %v162_v35 }
 0x134   :  { %344 = shalt.err (!%p341_p0)
}
 0x135   :  { %s345_s11 = scalar_lea.hbm %s459_s5, 128 }
 0x136   :  { %p346_p1 = scmp.ne.s32.totalorder %s459_s5, %s345_s11  ;;  %p349_p2 = scmp.lt.u32.totalorder %s345_s11, %s459_s5 }
 0x138   :  { %p351_p3 = pnand %p349_p2, %p346_p1 }
 0x13a   :  { %354 = shalt.err (!%p351_p3)
}
 0x13b   :  { %173 = dma.vmem_to_hbm [thread:$0]  %s171_s8, 128, %s459_s5, [#allocation4]  }
 0x13c   :  { %359 = dma.done.wait [#allocation4], 128  }
 0x13d   :  { %360 = vsyncadd [#allocation4], 4294967168 }
 0x13e   :  { %177 = vsyncpa [#allocation3], 1 }
 0x13f   :  { %178 = vsyncpa [#allocation6], 1 }
 0x140   :  { %179 = vsyncpa [#allocation4], 1 }

</bundles_post_ra>
